<compile_context>
chip_gen: v6e
topology: v6e:2x2x1
jax: 0.10.0
libtpu: 0.0.40
codegen_flags: <defaults>
</compile_context>

<pallas_src>
import jax
import jax.numpy as jnp
from jax import lax
from jax.experimental import pallas as pl
from jax.experimental.pallas import tpu as pltpu

LANE = 128                 # f32 lane width of a vreg
DEFAULT_TILE_B = 8192      # batch columns per grid step (sweepable 8K..32K)


def _round_up(x, m):
    return (x + m - 1) // m * m


def mlp_kernel(x_ref, w1t_ref, b1_ref, w2t_ref, b2_ref, o_ref):
    # x_ref: (tile_b, in_f) in native row-major layout.
    # fc1: contract over the minor feature axis of x so the result is
    #      (H, tile_b) with the batch on the LANE axis (lane-dense).
    h = lax.dot_general(
        w1t_ref[...], x_ref[...],
        dimension_numbers=(((1,), (1,)), ((), ())),
        preferred_element_type=jnp.float32,
    )                                                   # (H, tile_b)
    # bias broadcast across lanes + ReLU on the VPU (all f32)
    h = jnp.maximum(h + b1_ref[...], 0.0)
    # fc2: (out_f, H) @ (H, tile_b) -> (out_f, tile_b), still lane-dense.
    out = jnp.dot(w2t_ref[...], h, preferred_element_type=jnp.float32)
    o_ref[...] = (out + b2_ref[...]).astype(o_ref.dtype)


def mlp_forward(x, w1, b1, w2, b2, *, tile_b=DEFAULT_TILE_B):
    """y = relu(x @ w1 + b1) @ w2 + b2 ; x is (B, in_f) in PyTorch convention."""
    B, in_f = x.shape
    H = w1.shape[1]
    out_f = w2.shape[1]

    # --- batch tile selection ------------------------------------------------
    if B <= LANE:
        # Tiny batches: one (near-)exact block, no padding games.
        tile = _round_up(B, 8)
    else:
        tile = min(tile_b, _round_up(B, LANE))
        # Keep >= 2 grid steps so the ("parallel",) axis can actually split
        # across v7x's two TensorCores; harmless on v5e/v6e (single TC).
        tile = min(tile, _round_up(pl.cdiv(B, 2), LANE))
        tile = max(tile, LANE)
    grid = (pl.cdiv(B, tile),)

    x_f = x.astype(jnp.float32)                        # native (B, in_f) layout
    w1t = w1.T.astype(jnp.float32)                     # (H, in_f)
    w2t = w2.T.astype(jnp.float32)                     # (out_f, H)
    b1c = b1.reshape(H, 1).astype(jnp.float32)         # (H, 1)
    b2c = b2.reshape(out_f, 1).astype(jnp.float32)     # (out_f, 1)

    vmem = pltpu.MemorySpace.VMEM

    out_t = pl.pallas_call(
        mlp_kernel,
        out_shape=jax.ShapeDtypeStruct((out_f, B), jnp.float32),
        grid=grid,
        in_specs=[
            # x tiled along the batch (row) axis, native layout, no padding;
            # the partial last block is handled by Pallas.
            pl.BlockSpec((tile, in_f), lambda i: (i, 0), memory_space=vmem),
            # weights / biases: same block every step -> VMEM resident
            pl.BlockSpec((H, in_f), lambda i: (0, 0), memory_space=vmem),
            pl.BlockSpec((H, 1), lambda i: (0, 0), memory_space=vmem),
            pl.BlockSpec((out_f, H), lambda i: (0, 0), memory_space=vmem),
            pl.BlockSpec((out_f, 1), lambda i: (0, 0), memory_space=vmem),
        ],
        # lane-dense output tile: last dim is `tile` (>=128-multiple for big B,
        # or the full batch dim for tiny B) -> unmasked stores; OOB columns of
        # the partial last block are masked on writeback.
        out_specs=pl.BlockSpec((out_f, tile), lambda i: (0, i),
                               memory_space=vmem),
        compiler_params=pltpu.CompilerParams(
            dimension_semantics=("parallel",),       # megacore split on v7x
            vmem_limit_bytes=32 * 1024 * 1024,       # fits v7x's 64 MiB VMEM too
        ),
    )(x_f, w1t, b1c, w2t, b2c)

    # Back to PyTorch convention (B, out_features). Only the tiny (out_f, B)
    # result is transposed; the large x relayout/pad/slice passes are gone.
    return out_t.T


def init_params(key, in_features=4, hidden_units=32, out_features=3):
    """Deterministic PyTorch-Linear-style init: U(-1/sqrt(fan_in), 1/sqrt(fan_in))."""
    k1, k2, k3, k4 = jax.random.split(key, 4)
    bound1 = 1.0 / jnp.sqrt(in_features)
    bound2 = 1.0 / jnp.sqrt(hidden_units)
    w1 = jax.random.uniform(k1, (in_features, hidden_units), jnp.float32,
                            minval=-bound1, maxval=bound1)
    b1 = jax.random.uniform(k2, (hidden_units,), jnp.float32,
                            minval=-bound1, maxval=bound1)
    w2 = jax.random.uniform(k3, (hidden_units, out_features), jnp.float32,
                            minval=-bound2, maxval=bound2)
    b2 = jax.random.uniform(k4, (out_features,), jnp.float32,
                            minval=-bound2, maxval=bound2)
    return w1, b1, w2, b2


if __name__ == "__main__":
    key = jax.random.PRNGKey(0)
    k_x, k_p, k_x2 = jax.random.split(key, 3)

    hidden_units = 32
    w1, b1, w2, b2 = init_params(k_p, in_features=4,
                                 hidden_units=hidden_units, out_features=3)

    # Small batch (single exact block).
    batch = 8
    x = jax.random.normal(k_x, (batch, 4), jnp.float32)
    out = mlp_forward(x, w1, b1, w2, b2)
    jax.block_until_ready(out)
    ref = jnp.maximum(x @ w1 + b1, 0.0) @ w2 + b2
    assert out.shape == (batch, 3)
    assert jnp.allclose(out, ref, atol=1e-5, rtol=1e-5)

    # Ragged batch exercising grid > 1 with a masked partial last block.
    batch2 = 300
    x2 = jax.random.normal(k_x2, (batch2, 4), jnp.float32)
    out2 = mlp_forward(x2, w1, b1, w2, b2)
    jax.block_until_ready(out2)
    ref2 = jnp.maximum(x2 @ w1 + b1, 0.0) @ w2 + b2
    assert out2.shape == (batch2, 3)
    assert jnp.allclose(out2, ref2, atol=1e-5, rtol=1e-5)

    print("KERNEL_OK")
</pallas_src>

<mosaic_0001>
module attributes {stable_mosaic.version = 11 : i64} {
  func.func @mlp_kernel(%arg0: i32, %arg1: memref<8x4xf32, #tpu.memory_space<vmem>>, %arg2: memref<32x4xf32, #tpu.memory_space<vmem>>, %arg3: memref<32x1xf32, #tpu.memory_space<vmem>>, %arg4: memref<3x32xf32, #tpu.memory_space<vmem>>, %arg5: memref<3x1xf32, #tpu.memory_space<vmem>>, %arg6: memref<3x8xf32, #tpu.memory_space<vmem>>) attributes {dimension_semantics = [#tpu.dimension_semantics<parallel>], iteration_bounds = array<i64: 1>, scalar_prefetch = 0 : i64, scratch_operands = 0 : i64, tpu.core_type = #tpu.core_type<tc>, window_params = [{transform_indices = @transform_0, window_bounds = array<i64: 8, 4>}, {pipeline_mode = #tpu.pipeline_mode<synchronous>, transform_indices = @transform_1, window_bounds = array<i64: 32, 4>}, {pipeline_mode = #tpu.pipeline_mode<synchronous>, transform_indices = @transform_2, window_bounds = array<i64: 32, 1>}, {pipeline_mode = #tpu.pipeline_mode<synchronous>, transform_indices = @transform_3, window_bounds = array<i64: 3, 32>}, {pipeline_mode = #tpu.pipeline_mode<synchronous>, transform_indices = @transform_4, window_bounds = array<i64: 3, 1>}, {transform_indices = @transform_5, window_bounds = array<i64: 3, 8>}]} {
    %c0 = arith.constant 0 : index
    %c0_0 = arith.constant 0 : index
    %0 = vector.load %arg2[%c0, %c0_0] : memref<32x4xf32, #tpu.memory_space<vmem>>, vector<32x4xf32>
    %c0_1 = arith.constant 0 : index
    %c0_2 = arith.constant 0 : index
    %1 = vector.load %arg1[%c0_1, %c0_2] : memref<8x4xf32, #tpu.memory_space<vmem>>, vector<8x4xf32>
    %cst = arith.constant dense<0.000000e+00> : vector<32x8xf32>
    %2 = tpu.matmul %0, %1, %cst {dimension_numbers = #tpu.dot_dimension_numbers<[1], [1], [0], [0], [0, 0, 1, 0], [], []>} : vector<32x4xf32>, vector<8x4xf32>, vector<32x8xf32> -> vector<32x8xf32>
    %c0_3 = arith.constant 0 : index
    %c0_4 = arith.constant 0 : index
    %3 = vector.load %arg3[%c0_3, %c0_4] : memref<32x1xf32, #tpu.memory_space<vmem>>, vector<32x1xf32>
    %4 = vector.broadcast %3 : vector<32x1xf32> to vector<32x8xf32>
    %5 = arith.addf %2, %4 : vector<32x8xf32>
    %cst_5 = arith.constant 0.000000e+00 : f32
    %6 = vector.broadcast %cst_5 : f32 to vector<32x8xf32>
    %7 = arith.maximumf %5, %6 : vector<32x8xf32>
    %c0_6 = arith.constant 0 : index
    %c0_7 = arith.constant 0 : index
    %8 = vector.load %arg4[%c0_6, %c0_7] : memref<3x32xf32, #tpu.memory_space<vmem>>, vector<3x32xf32>
    %cst_8 = arith.constant dense<0.000000e+00> : vector<3x8xf32>
    %9 = tpu.matmul %8, %7, %cst_8 {dimension_numbers = #tpu.dot_dimension_numbers<[1], [0], [0], [1], [0, 0, 1, 1], [], []>} : vector<3x32xf32>, vector<32x8xf32>, vector<3x8xf32> -> vector<3x8xf32>
    %c0_9 = arith.constant 0 : index
    %c0_10 = arith.constant 0 : index
    %10 = vector.load %arg5[%c0_9, %c0_10] : memref<3x1xf32, #tpu.memory_space<vmem>>, vector<3x1xf32>
    %11 = vector.broadcast %10 : vector<3x1xf32> to vector<3x8xf32>
    %12 = arith.addf %9, %11 : vector<3x8xf32>
    %c0_11 = arith.constant 0 : index
    %c0_12 = arith.constant 0 : index
    %13 = vector.load %arg6[%c0_11, %c0_12] : memref<3x8xf32, #tpu.memory_space<vmem>>, vector<3x8xf32>
    tpu.vector_store %arg6[%c0_11, %c0_12], %12 {strides = array<i32>} : memref<3x8xf32, #tpu.memory_space<vmem>>, vector<3x8xf32>,
    return
  }
  func.func @transform_0(%arg0: i32) -> (i32, i32) {
    %c0_i32 = arith.constant 0 : i32
    %c0_i32_0 = arith.constant 0 : i32
    return %arg0, %c0_i32 : i32, i32
  }
  func.func @transform_1(%arg0: i32) -> (i32, i32) {
    %c0_i32 = arith.constant 0 : i32
    %c0_i32_0 = arith.constant 0 : i32
    %c0_i32_1 = arith.constant 0 : i32
    return %c0_i32, %c0_i32_0 : i32, i32
  }
  func.func @transform_2(%arg0: i32) -> (i32, i32) {
    %c0_i32 = arith.constant 0 : i32
    %c0_i32_0 = arith.constant 0 : i32
    %c0_i32_1 = arith.constant 0 : i32
    return %c0_i32, %c0_i32_0 : i32, i32
  }
  func.func @transform_3(%arg0: i32) -> (i32, i32) {
    %c0_i32 = arith.constant 0 : i32
    %c0_i32_0 = arith.constant 0 : i32
    %c0_i32_1 = arith.constant 0 : i32
    return %c0_i32, %c0_i32_0 : i32, i32
  }
  func.func @transform_4(%arg0: i32) -> (i32, i32) {
    %c0_i32 = arith.constant 0 : i32
    %c0_i32_0 = arith.constant 0 : i32
    %c0_i32_1 = arith.constant 0 : i32
    return %c0_i32, %c0_i32_0 : i32, i32
  }
  func.func @transform_5(%arg0: i32) -> (i32, i32) {
    %c0_i32 = arith.constant 0 : i32
    %c0_i32_0 = arith.constant 0 : i32
    return %c0_i32, %arg0 : i32, i32
  }
}

</mosaic_0001>

<bundles_post_ra>
// kernel: tpu_custom_call.1
= control target key start
LH: loop header
LB: loop body
LE: loop exit
PB: predicated region body
PF: predicated region fallthrough
CT: control target
= control target key end

     0   :  { %vm50_vm0 = vcmask 31744   ;;  %v315_v4 = vmov 0   ;;  %s391_s0 = inlined_call_operand.vmem [shape: f32[8,4], index: 0, kind: input, shape index: {}]   ;;  %s392_s1 = inlined_call_operand.vmem [shape: f32[32,4], index: 1, kind: input, shape index: {}]   ;;  %s393_s2 = inlined_call_operand.vmem [shape: f32[32,1], index: 2, kind: input, shape index: {}]   ;;  %s394_s3 = inlined_call_operand.vmem [shape: f32[3,32], index: 3, kind: input, shape index: {}]   ;;  %s395_s4 = inlined_call_operand.vmem [shape: f32[3,1], index: 4, kind: input, shape index: {}]   ;;  %s396_s5 = inlined_call_operand.hbm [shape: f32[3,8], index: 5, kind: output, shape index: {}]  }
   0x1   :  { %v25_v0 = vld [vmem:[%s391_s0] sm:$0xff]  ;;  %v29_v2 = vld [vmem:[%s393_s2 + $0x18] sm:$0xff]  ;;  %v22_v3 = vld [vmem:[%s392_s1 + $0x8] sm:$0xff]  ;;  %291 = vset.pattern.permute.xlu0 %v315_v4  ;;  %292 = vset.pattern.permute.xlu1 %v315_v4 }
   0x2   :  { %v21_v1 = vld [vmem:[%s392_s1] sm:$0xff]  ;;  %268 = vmatprep.subr.msk.mxu0 %vm50_vm0, %v25_v0  ;;  %v27_v5 = vld [vmem:[%s393_s2 + $0x8] sm:$0xff]  ;;  %v23_v6 = vld [vmem:[%s392_s1 + $0x10] sm:$0xff]  ;;  %47 = vperm.xlu0 %291, %v29_v2  }
   0x3   :  { %270 = vmatprep.mubr.msk.f32.mxu0 %vm50_vm0, %v21_v1  ;;  %269 = vmatpush3.xpose.msk.msra.mxu0 %vm50_vm0, %v25_v0 }
   0x4   :  { %10 = vsyncpa [#allocation3], 0  ;;  %v28_v7 = vld [vmem:[%s393_s2 + $0x10] sm:$0xff]  ;;  %37 = vperm.xlu1 %292, %v27_v5   ;;  %v26_v8 = vld [vmem:[%s393_s2] sm:$0xff]  ;;  %v316_v11 = vmov 0.0   ;;  %vm317_vm1 = vmmov 0  }
   0x5   :  { %v24_v9 = vld [vmem:[%s392_s1 + $0x18] sm:$0xff]  ;;  %v156_v10 = vld [vmem:[%s395_s4] sm:$0x7]  ;;  %276 = vmatprep.subr.mxu1 %v316_v11  ;;  %284 = vmatprep.mubr.msk.f32.mxu1 %vm317_vm1, %v316_v11  ;;  %vm162_vm2 = vcmask 261120   ;;  %s318_s4 = smov [#allocation2]   ;;  %vm236_vm3 = vcmask 59392  }
   0x6   :  { %271 = vmatmul.mubr.msk.f32.vlgmr.msra.gmra.mxu0 %vm50_vm0, %v22_v3  ;;  %42 = vperm.xlu0 %291, %v28_v7   ;;  %v155_v28 = vld [vmem:[%s394_s3] sm:$0x7]  ;;  %s244_s12 = sshll.u32 %s318_s4, 4  ;;  %s245_s12 = int_to_ptr.vmem [resolvable:$true] %s244_s12 }
   0x7   :  { %273 = vmatprep.mubr.msk.f32.mxu0 %vm50_vm0, %v23_v6  ;;  %s293_s13 = scalar_lea.vmem %s245_s12, 64  ;;  %p298_p1 = scmp.lt.s32.totalorder %s245_s12, %s245_s12 }
   0x8   :  { %32 = vperm.xlu1 %292, %v26_v8   ;;  %p294_p0 = scmp.ne.s32.totalorder %s245_s12, %s293_s13  ;;  %p299_p2 = scmp.lt.s32.totalorder %s293_s13, %s293_s13 }
   0xa   :  { %274 = vmatmul.mubr.msk.f32.gmra.mxu0 %vm50_vm0, %v24_v9  ;;  %159 = vperm.xlu0 %291, %v156_v10   ;;  %p300_p3 = por %p299_p2, %p298_p1 }
   0xc   :  { %p301_p4 = pnand %p300_p3, %p294_p0 }
  0x7d   :  { %v48_v12 = vpop.permute.xlu0 %47 }
  0x7f   :  { %v38_v13 = vpop.permute.xlu1 %37 }
  0x81   :  { %v43_v17 = vpop.permute.xlu0 %42 }
  0x83   :  { %v33_v19 = vpop.permute.xlu1 %32 }
  0x85   :  { %v160_v29 = vpop.permute.xlu0 %159 }
  0xc6   :  { %v272_v14 = vpop.f32.mrf.mxu0 }
  0xc7   :  { %v138_v21 = vadd.f32 %v272_v14, %v38_v13 }
  0xc8   :  { %v132_v15 = vpop.f32.mrf.mxu0 }
  0xc9   :  { %v133_v24 = vadd.f32 %v132_v15, %v33_v19  ;;  %v152_v26 = vmax.f32 %v138_v21, 0.0 }
  0xca   :  { %v275_v16 = vpop.f32.mrf.mxu0 }
  0xcb   :  { %v148_v18 = vadd.f32 %v275_v16, %v48_v12  ;;  %v151_v27 = vmax.f32 %v133_v24, 0.0 }
  0xcc   :  { %v142_v20 = vpop.f32.mrf.mxu0 }
  0xcd   :  { %v154_v22 = vmax.f32 %v148_v18, 0.0  ;;  %v143_v23 = vadd.f32 %v142_v20, %v43_v17 }
  0xcf   :  { %v153_v25 = vmax.f32 %v143_v23, 0.0  ;;  %277 = vmatpush3.msra.mxu1 %v154_v22 }
  0xd0   :  { %278 = vmatprep.subr.mxu1 %v316_v11 }
  0xd1   :  { %279 = vmatpush3.msra.mxu1 %v153_v25 }
  0xd2   :  { %280 = vmatprep.subr.mxu1 %v316_v11 }
  0xd3   :  { %281 = vmatpush3.msra.mxu1 %v152_v26 }
  0xd4   :  { %282 = vmatprep.subr.mxu1 %v316_v11 }
  0xd5   :  { %283 = vmatpush3.msra.mxu1 %v151_v27 }
  0xd6   :  { %285 = vmatmul.mubr.msk.f32.vlgmr.msra.gmra.mxu1 %vm162_vm2, %v155_v28 }
 0x196   :  { %v232_v30 = vpop.f32.mrf.mxu1 }
 0x197   :  { %v233_v31 = vadd.f32 %v232_v30, %v160_v29 }
 0x198   :  { %v286_v32 = vpop.f32.mrf.mxu1 }
 0x199   :  { %237 = vst.msk [vmem:[#allocation2] sm:$0x7] %vm236_vm3, %v233_v31 }
 0x19a   :  { %304 = shalt.err (!%p301_p4)
}
 0x19b   :  { %247 = dma.vmem_to_hbm [thread:$0]  %s245_s12, 64, %s396_s5, [#allocation3]  }
 0x19c   :  { %313 = dma.done.wait [#allocation3], 64  }
 0x19d   :  { %314 = vsyncadd [#allocation3], 4294967232 }
 0x19e   :  { %251 = vsyncpa [#allocation3], 1 }

</bundles_post_ra>
